<compile_context>
chip_gen: v6e
topology: v6e:2x2x1
jax: 0.10.0
libtpu: 0.0.40
codegen_flags: <defaults>
</compile_context>

<pallas_src>
import functools
import math

import jax
import jax.numpy as jnp
from jax.experimental import pallas as pl
from jax.experimental.pallas import tpu as pltpu


def _build_kernel(T_I, T_R, t0, eta, intervention, B, S):
    """Returns the Pallas kernel body for the SIR-graph ODE RHS."""
    inv_T_I = 1.0 / float(T_I)
    inv_T_R = 1.0 / float(T_R)
    t0 = float(t0)
    eta = float(eta)
    eps = 0.001
    # compile-time constant: 2*log((1-eps)/eps)  (removes an in-kernel log)
    r_const = 2.0 * math.log((1.0 - eps) / eps)

    def kernel(t_ref, y_ref, m_ref, p_ref, out_ref):
        # y_ref: [3B, S] rows = Inf (0..B-1), Sus (B..2B-1), Conf (2B..3B-1)
        # All compartment views are static sublane-aligned slices (free).
        inf = y_ref[0:B, :]             # [B, S]
        sus = y_ref[B:2 * B, :]         # [B, S]
        conf = y_ref[2 * B:3 * B, :]    # [B, S]
        M = m_ref[...]                  # [S, S] = omega * (pij^T - I)

        params = p_ref[...]             # [B, 4] : (4*sigmoid, relu, sigmoid, relu)
        p0 = params[:, 0:1]             # r0     -> [B, 1]
        p2 = params[:, 2:3]             # alpha  -> [B, 1]

        # One stacked [2B,S] @ [S,S] MXU matmul straight off a static row view
        # (Inf rows then Sus rows); M already folds "- x" and the omega scale.
        coupled = jnp.dot(y_ref[0:2 * B, :], M,
                          preferred_element_type=jnp.float32)   # [2B, S]
        i_coup = coupled[:B]            # omega * (Inf @ pij^T - Inf)
        s_coup = coupled[B:]            # omega * (Sus @ pij^T - Sus)

        inf_over_TI = inf * inv_T_I                              # reused 3x
        cross = p0 * inf_over_TI * sus                           # [B, S]

        if intervention:
            # decay is constant per batch row -> all transcendentals on [B,1];
            # exact division (not approx reciprocal) is free at this size and
            # keeps the tight 1e-5 tolerance.
            p3 = params[:, 3:4]                                  # rate_time [B,1]
            t = t_ref[0]                                         # scalar from SMEM
            r = r_const / p3
            x0 = t0 + 0.5 * p3
            z = jnp.exp(r * (t - x0))                            # [B, 1]
            decay = eta / (1.0 + z) + (1.0 - eta)
            cross = cross * decay                                # broadcast [B,1]

        # Three compartment-aligned [B,S] stores (no lane-concatenate, no
        # masked 48-lane store).
        out_ref[0] = cross - inf_over_TI + i_coup                # dInf
        out_ref[1] = p2 * inf_over_TI - conf * inv_T_R           # dConf
        out_ref[2] = s_coup - cross                              # dSus

    return kernel


def form_parameter(pps):
    """Mirrors my_parameters.form_parameter (parameter setup glue, plain JAX).

    Computed once (like self.parameters in the module) and passed to forward.
    """
    sig = jax.nn.sigmoid(pps)
    rel = jnp.maximum(pps, 0.0)
    return jnp.stack(
        [4.0 * sig[:, 0], rel[:, 1], sig[:, 2], rel[:, 3]], axis=1
    ).astype(jnp.float32)


def precompute_coupling(pij, omega):
    """M = omega * (pij^T - I). t/y-invariant: compute ONCE, outside any ODE loop."""
    S = pij.shape[0]
    return (float(omega)
            * (pij.T.astype(jnp.float32) - jnp.eye(S, dtype=jnp.float32)))


@functools.partial(
    jax.jit,
    static_argnames=("T_I", "T_R", "t0", "eta", "intervention"),
)
def my_parameters_forward(t, y, params, M, *, T_I, T_R,
                          t0=22.0, eta=1.0, intervention=False):
    """Pallas implementation of my_parameters.forward.

    `params` = form_parameter(pps), `M` = precompute_coupling(pij, omega);
    both are step-invariant and hoisted out of the per-step path.
    """
    B, threeS = y.shape
    S = threeS // 3

    # Layout plumbing only: [B, 3S] -> row-stacked [3B, S] (Inf | Sus | Conf).
    # TODO(synk): for a real ODE integrator, keep the state in this [3B, S]
    # layout end-to-end and fuse many RHS evaluations / RK stages into one
    # pallas_call (grid axis or in-kernel fori over VMEM-resident state) so
    # the ~1-2 us dispatch/DMA overhead is amortized.
    y3 = y.astype(jnp.float32).reshape(B, 3, S)
    y_rows = jnp.concatenate([y3[:, 0], y3[:, 2], y3[:, 1]], axis=0)  # [3B, S]

    kernel = _build_kernel(T_I, T_R, t0, eta, intervention, B, S)

    vmem = pl.BlockSpec(memory_space=pltpu.MemorySpace.VMEM)
    smem = pl.BlockSpec(memory_space=pltpu.MemorySpace.SMEM)

    # TODO(synk): if B or S grows, add a grid over batch/node blocks with
    # dimension_semantics=("parallel", ...) (2 TCs on v7x), cast the matmul
    # operands (y_rows, M) to bf16 for the MXU on v6e/v7x, and budget M
    # against v7x's 64 MiB VMEM via pltpu.CompilerParams(vmem_limit_bytes=...).
    out3 = pl.pallas_call(
        kernel,
        out_shape=jax.ShapeDtypeStruct((3, B, S), jnp.float32),
        in_specs=[smem, vmem, vmem, vmem],
        out_specs=vmem,
    )(
        jnp.reshape(jnp.asarray(t, jnp.float32), (1,)),
        y_rows,
        M.astype(jnp.float32),
        params.astype(jnp.float32),
    )

    # Assemble the PyTorch-style [B, 3S] = (dInf | dConf | dSus) wrapper-side.
    return jnp.transpose(out3, (1, 0, 2)).reshape(B, 3 * S)


def _reference_forward(t, y, pps, pij, *, T_I, T_R, omega,
                       t0=22.0, eta=1.0, intervention=False):
    """Pure-JAX reference mirroring the PyTorch forward exactly."""
    S = y.shape[1] // 3
    params = form_parameter(pps)
    Inf, Conf, Sus = y[:, :S], y[:, S:2 * S], y[:, 2 * S:]
    pijT = pij.T
    I_term = Inf @ pijT - Inf
    Sus_term = Sus @ pijT - Sus
    cross = params[:, 0:1] * Inf * Sus / T_I
    if intervention:
        rate_time = jnp.broadcast_to(params[:, 3:4], Inf.shape)
        eps = 0.001
        r = 2.0 * jnp.log((1.0 - eps) / eps) / rate_time
        x0 = t0 + rate_time / 2.0
        decay = eta / (1.0 + jnp.exp(r * (t - x0))) + 1.0 - eta
        cross = cross * decay
    dinf = cross - Inf / T_I + omega * I_term
    dconf = params[:, 2:3] * Inf / T_I - Conf / T_R
    dsus = -cross + omega * Sus_term
    return jnp.concatenate([dinf, dconf, dsus], axis=1)


if __name__ == "__main__":
    key = jax.random.PRNGKey(0)
    k_pps, k_y, k_pij = jax.random.split(key, 3)

    B = 8        # batch of parameter samples
    S = 16       # number of graph nodes (sz)

    # Parameter init mirrors __init__: rand([B,4]); col1 *= 500; col3 *= 100.
    pps = jax.random.uniform(k_pps, (B, 4), dtype=jnp.float32)
    pps = pps.at[:, 1].multiply(500.0)
    pps = pps.at[:, 3].multiply(100.0)

    y = jax.random.uniform(k_y, (B, 3 * S), dtype=jnp.float32)
    pij = jax.random.uniform(k_pij, (S, S), dtype=jnp.float32)

    T_I, T_R, omega = 5.0, 14.0, 0.1
    t = 3.0

    # Step-invariant precomputation (hoisted out of the per-step path).
    params = form_parameter(pps)
    M = precompute_coupling(pij, omega)

    ok = True
    for intervention in (False, True):
        out = my_parameters_forward(
            t, y, params, M, T_I=T_I, T_R=T_R,
            t0=22.0, eta=1.0, intervention=intervention)
        out = jax.block_until_ready(out)
        ref = _reference_forward(
            t, y, pps, pij, T_I=T_I, T_R=T_R, omega=omega,
            t0=22.0, eta=1.0, intervention=intervention)
        ok = ok and bool(jnp.allclose(out, ref, rtol=1e-5, atol=1e-5))

    assert ok, "Pallas kernel output does not match reference"
    print("KERNEL_OK")
</pallas_src>

<mosaic_0001>
module attributes {stable_mosaic.version = 11 : i64} {
  func.func @kernel(%arg0: memref<1xf32, #tpu.memory_space<smem>>, %arg1: memref<24x16xf32, #tpu.memory_space<vmem>>, %arg2: memref<16x16xf32, #tpu.memory_space<vmem>>, %arg3: memref<8x4xf32, #tpu.memory_space<vmem>>, %arg4: memref<3x8x16xf32, #tpu.memory_space<vmem>>) attributes {dimension_semantics = [], scalar_prefetch = 0 : i64, scratch_operands = 0 : i64, tpu.core_type = #tpu.core_type<tc>} {
    %c0 = arith.constant 0 : index
    %c0_0 = arith.constant 0 : index
    %0 = vector.load %arg1[%c0, %c0_0] : memref<24x16xf32, #tpu.memory_space<vmem>>, vector<8x16xf32>
    %c8 = arith.constant 8 : index
    %c0_1 = arith.constant 0 : index
    %1 = vector.load %arg1[%c8, %c0_1] : memref<24x16xf32, #tpu.memory_space<vmem>>, vector<8x16xf32>
    %c16 = arith.constant 16 : index
    %c0_2 = arith.constant 0 : index
    %2 = vector.load %arg1[%c16, %c0_2] : memref<24x16xf32, #tpu.memory_space<vmem>>, vector<8x16xf32>
    %c0_3 = arith.constant 0 : index
    %c0_4 = arith.constant 0 : index
    %3 = vector.load %arg2[%c0_3, %c0_4] : memref<16x16xf32, #tpu.memory_space<vmem>>, vector<16x16xf32>
    %c0_5 = arith.constant 0 : index
    %c0_6 = arith.constant 0 : index
    %4 = vector.load %arg3[%c0_5, %c0_6] : memref<8x4xf32, #tpu.memory_space<vmem>>, vector<8x4xf32>
    %5 = vector.extract_strided_slice %4 {offsets = [0, 0], sizes = [8, 1], strides = [1, 1]} : vector<8x4xf32> to vector<8x1xf32>
    %6 = vector.extract_strided_slice %4 {offsets = [0, 2], sizes = [8, 1], strides = [1, 1]} : vector<8x4xf32> to vector<8x1xf32>
    %c0_7 = arith.constant 0 : index
    %c0_8 = arith.constant 0 : index
    %7 = vector.load %arg1[%c0_7, %c0_8] : memref<24x16xf32, #tpu.memory_space<vmem>>, vector<16x16xf32>
    %cst = arith.constant dense<0.000000e+00> : vector<16x16xf32>
    %8 = tpu.matmul %7, %3, %cst {dimension_numbers = #tpu.dot_dimension_numbers<[1], [0], [0], [1], [0, 0, 1, 1], [], []>} : vector<16x16xf32>, vector<16x16xf32>, vector<16x16xf32> -> vector<16x16xf32>
    %9 = vector.extract_strided_slice %8 {offsets = [0, 0], sizes = [8, 16], strides = [1, 1]} : vector<16x16xf32> to vector<8x16xf32>
    %10 = vector.extract_strided_slice %8 {offsets = [8, 0], sizes = [8, 16], strides = [1, 1]} : vector<16x16xf32> to vector<8x16xf32>
    %cst_9 = arith.constant 2.000000e-01 : f32
    %11 = vector.broadcast %cst_9 : f32 to vector<8x16xf32>
    %12 = arith.mulf %0, %11 : vector<8x16xf32>
    %13 = vector.broadcast %5 : vector<8x1xf32> to vector<8x16xf32>
    %14 = arith.mulf %13, %12 : vector<8x16xf32>
    %15 = arith.mulf %14, %1 : vector<8x16xf32>
    %16 = arith.subf %15, %12 : vector<8x16xf32>
    %17 = arith.addf %16, %9 : vector<8x16xf32>
    %c0_10 = arith.constant 0 : index
    %c0_11 = arith.constant 0 : index
    %c0_12 = arith.constant 0 : index
    %18 = vector.load %arg4[%c0_10, %c0_11, %c0_12] : memref<3x8x16xf32, #tpu.memory_space<vmem>>, vector<1x8x16xf32>
    %19 = vector.shape_cast %18 : vector<1x8x16xf32> to vector<8x16xf32>
    %20 = vector.shape_cast %17 : vector<8x16xf32> to vector<1x8x16xf32>
    tpu.vector_store %arg4[%c0_10, %c0_11, %c0_12], %20 {strides = array<i32>} : memref<3x8x16xf32, #tpu.memory_space<vmem>>, vector<1x8x16xf32>,
    %21 = vector.broadcast %6 : vector<8x1xf32> to vector<8x16xf32>
    %22 = arith.mulf %21, %12 : vector<8x16xf32>
    %cst_13 = arith.constant 0.0714285746 : f32
    %23 = vector.broadcast %cst_13 : f32 to vector<8x16xf32>
    %24 = arith.mulf %2, %23 : vector<8x16xf32>
    %25 = arith.subf %22, %24 : vector<8x16xf32>
    %c1 = arith.constant 1 : index
    %c0_14 = arith.constant 0 : index
    %c0_15 = arith.constant 0 : index
    %26 = vector.load %arg4[%c1, %c0_14, %c0_15] : memref<3x8x16xf32, #tpu.memory_space<vmem>>, vector<1x8x16xf32>
    %27 = vector.shape_cast %26 : vector<1x8x16xf32> to vector<8x16xf32>
    %28 = vector.shape_cast %25 : vector<8x16xf32> to vector<1x8x16xf32>
    tpu.vector_store %arg4[%c1, %c0_14, %c0_15], %28 {strides = array<i32>} : memref<3x8x16xf32, #tpu.memory_space<vmem>>, vector<1x8x16xf32>,
    %29 = arith.subf %10, %15 : vector<8x16xf32>
    %c2 = arith.constant 2 : index
    %c0_16 = arith.constant 0 : index
    %c0_17 = arith.constant 0 : index
    %30 = vector.load %arg4[%c2, %c0_16, %c0_17] : memref<3x8x16xf32, #tpu.memory_space<vmem>>, vector<1x8x16xf32>
    %31 = vector.shape_cast %30 : vector<1x8x16xf32> to vector<8x16xf32>
    %32 = vector.shape_cast %29 : vector<8x16xf32> to vector<1x8x16xf32>
    tpu.vector_store %arg4[%c2, %c0_16, %c0_17], %32 {strides = array<i32>} : memref<3x8x16xf32, #tpu.memory_space<vmem>>, vector<1x8x16xf32>,
    return
  }
}

</mosaic_0001>

<bundles_post_ra>
// kernel: my_parameters_forward.1
= control target key start
LH: loop header
LB: loop body
LE: loop exit
PB: predicated region body
PF: predicated region fallthrough
CT: control target
= control target key end

     0   :  { %vm24_vm0 = vcmask 130048   ;;  %v152_v3 = vmov 0   ;;  %v153_v6 = vmov 2   ;;  %s211_s0 = inlined_call_operand.<no memory space> [shape: f32[1], index: 0, kind: input, shape index: {}]   ;;  %s212_s2 = inlined_call_operand.vmem [shape: f32[16,16], index: 2, kind: input, shape index: {}]   ;;  %s213_s1 = inlined_call_operand.vmem [shape: f32[24,16], index: 1, kind: input, shape index: {}]   ;;  %s214_s3 = inlined_call_operand.vmem [shape: f32[8,4], index: 3, kind: input, shape index: {}]   ;;  %s215_s4 = inlined_call_operand.vmem [shape: f32[3,8,16], index: 4, kind: output, shape index: {}]  }
   0x1   :  { %v22_v0 = vld [vmem:[%s212_s2 + $0x8] sm:$0xff]  ;;  %v21_v1 = vld [vmem:[%s212_s2] sm:$0xff]  ;;  %150 = vset.pattern.permute.xlu0 %v152_v3  ;;  %v20_v10 = vld [vmem:[%s213_s1 + $0x10] sm:$0xff] }
   0x2   :  { %v18_v2 = vld [vmem:[%s213_s1] sm:$0xff]  ;;  %141 = vmatprep.subr.mxu0 %v22_v0  ;;  %v19_v5 = vld [vmem:[%s213_s1 + $0x8] sm:$0xff]  ;;  %v122_v12 = vmul.f32 0.071428575, %v20_v10 }
   0x3   :  { %145 = vmatprep.mubr.msk.f32.mxu0 %vm24_vm0, %v18_v2  ;;  %v23_v4 = vld [vmem:[%s214_s3] sm:$0xff]  ;;  %142 = vmatpush3.msra.mxu0 %v22_v0  ;;  %v106_v7 = vmul.f32 0.2, %v18_v2 }
   0x4   :  { %109 = vperm.xlu0 %150, %v23_v4   ;;  %143 = vmatprep.subr.mxu0 %v21_v1 }
   0x5   :  { %144 = vmatpush3.msra.mxu0 %v21_v1 }
   0x6   :  { %146 = vmatmul.mubr.msk.f32.vlgmr.msra.gmra.mxu0 %vm24_vm0, %v19_v5 }
   0x8   :  { %151 = vset.pattern.permute.xlu0 %v153_v6 }
   0x9   :  { %118 = vperm.xlu0 %151, %v23_v4  }
  0x7f   :  { %v110_v8 = vpop.permute.xlu0 %109 }
  0x80   :  { %v112_v9 = vmul.f32 %v110_v8, %v106_v7 }
  0x82   :  { %v113_v11 = vmul.f32 %v112_v9, %v19_v5 }
  0x84   :  { %v119_v13 = vpop.permute.xlu0 %118  ;;  %v114_v14 = vsub.f32 %v113_v11, %v106_v7 }
  0x85   :  { %v121_v15 = vmul.f32 %v119_v13, %v106_v7 }
  0x87   :  { %v123_v16 = vsub.f32 %v121_v15, %v122_v12 }
  0x89   :  { %135 = vst.msk [vmem:[%s215_s4 + $0x8] sm:$0xff] %vm24_vm0, %v123_v16 }
  0xc6   :  { %v147_v17 = vpop.f32.mrf.mxu0 }
  0xc7   :  { %v126_v18 = vsub.f32 %v147_v17, %v113_v11 }
  0xc8   :  { %v97_v19 = vpop.f32.mrf.mxu0 }
  0xc9   :  { %136 = vst.msk [vmem:[%s215_s4 + $0x10] sm:$0xff] %vm24_vm0, %v126_v18  ;;  %v115_v20 = vadd.f32 %v114_v14, %v97_v19 }
  0xcb   :  { %116 = vst.msk [vmem:[%s215_s4] sm:$0xff] %vm24_vm0, %v115_v20 }

</bundles_post_ra>
